<compile_context>
chip_gen: v7x
topology: tpu7x:2x2x1
jax: 0.10.0
libtpu: 0.0.40
codegen_flags: <defaults>
</compile_context>

<pallas_src>
import functools

import jax
import jax.numpy as jnp
from jax import lax
from jax.experimental import pallas as pl
from jax.experimental.pallas import tpu as pltpu


# ----------------------------- hardware helpers -----------------------------

def _device_kind() -> str:
    try:
        return jax.devices()[0].device_kind.lower()
    except Exception:
        return ""


def _has_bf16_eup() -> bool:
    # v6e / v7x have a native bf16 EUP path; v5e and older do not.
    kind = _device_kind()
    return any(tag in kind for tag in ("v6", "v7", "7x"))


def _physical_vmem_bytes() -> int:
    try:
        v = int(pltpu.get_tpu_info().vmem_capacity_bytes)
        if v >= (16 << 20):
            return v
    except Exception:
        pass
    kind = _device_kind()
    return (64 << 20) if any(t in kind for t in ("v7", "7x")) else (128 << 20)


# --------------------------------- kernel -----------------------------------

def _cum_ce_kernel(
    logits_ref, labels_ref, out_ref,
    m_sc, l_sc, tgt_sc,
    *, ignore_index, vocab_size, seq_len, t_tile, v_tile, bf16_exp,
):
    t_idx = pl.program_id(1)
    v_idx = pl.program_id(2)
    n_v = pl.num_programs(2)

    vocab_ragged = (vocab_size % v_tile) != 0
    seq_ragged = (seq_len % t_tile) != 0

    # ---- init per-(batch, seq-tile) online-logsumexp state at first vocab tile ----
    @pl.when(v_idx == 0)
    def _():
        m_sc[...] = jnp.full(m_sc.shape, -jnp.inf, dtype=m_sc.dtype)
        l_sc[...] = jnp.zeros(l_sc.shape, l_sc.dtype)
        tgt_sc[...] = jnp.zeros(tgt_sc.shape, tgt_sc.dtype)

    x = logits_ref[0]        # (t_tile, v_tile), input dtype (no full f32 copy)
    lbl = labels_ref[0]      # (t_tile, 1) int32

    # Local column ids only; the label is shifted instead of the iota
    # (saves a full-tile VALU add per vocab step).
    col_iota = lax.broadcasted_iota(jnp.int32, (t_tile, v_tile), 1)
    lbl_local = lbl - v_idx * v_tile                                  # (t_tile, 1)

    def accumulate(mask_tail):
        if mask_tail:
            # Only the last, ragged vocab tile pays for masking; the tail width
            # is a static constant.
            tail = vocab_size % v_tile
            col_ok = col_iota < tail
            x_for_max = jnp.where(col_ok, x, jnp.asarray(-jnp.inf, x.dtype))
        else:
            x_for_max = x

        tile_max = jnp.max(x_for_max, axis=-1, keepdims=True).astype(jnp.float32)
        m_prev = m_sc[...]
        m_new = jnp.maximum(m_prev, tile_max)
        alpha = jnp.exp(m_prev - m_new)          # rescale factor for running sum

        if bf16_exp:
            # bf16 EUP path (v6e/v7x): the running max is bf16-exact, so the
            # subtract + exp stay fully in bf16; only the row-sum is f32.
            p = jnp.exp(x - m_new.astype(x.dtype))
        else:
            p = jnp.exp(x.astype(jnp.float32) - m_new)
        if mask_tail:
            p = jnp.where(col_ok, p, jnp.asarray(0, p.dtype))
        l_sc[...] = alpha * l_sc[...] + jnp.sum(
            p, axis=-1, keepdims=True, dtype=jnp.float32)
        m_sc[...] = m_new

        # Fused target-logit extraction: at most one hit per row (labels are
        # < vocab_size and ignore_index is negative, so padded columns and
        # ignored rows never match).  Scalar 0, no zeros_like broadcast.
        is_tgt = col_iota == lbl_local
        tgt_sc[...] += jnp.sum(
            jnp.where(is_tgt, x, jnp.asarray(0, x.dtype)),
            axis=-1, keepdims=True).astype(jnp.float32)

    if vocab_ragged:
        @pl.when(v_idx < n_v - 1)
        def _():
            accumulate(mask_tail=False)          # interior tiles: no mask work

        @pl.when(v_idx == n_v - 1)
        def _():
            accumulate(mask_tail=True)           # only the ragged tail is masked
    else:
        accumulate(mask_tail=False)

    # ---- finalize: per-position CE loss, masked; cumsum/normalize in wrapper ----
    @pl.when(v_idx == n_v - 1)
    def _():
        lse = m_sc[...] + jnp.log(l_sc[...])                          # (t_tile, 1)
        loss = lse - tgt_sc[...]

        valid = lbl != ignore_index
        if seq_ragged:
            row_ids = lax.broadcasted_iota(jnp.int32, (t_tile, 1), 0) + t_idx * t_tile
            valid = valid & (row_ids < seq_len)
        out_ref[...] = jnp.where(valid, loss, 0.0).reshape(1, t_tile, 1)


# -------------------------------- wrapper -----------------------------------

def cum_gpt_lm_loss(logits, labels, *, max_len, ignore_index=-100,
                    t_tile_max=256, v_tile_max=None, use_bf16_exp=None,
                    vmem_limit_bytes=None):
    """Pallas TPU implementation of CumGPTLMLoss.forward.

    logits: [B, T, V] (T == max_len), labels: [B, T] int.
    Returns cum_loss: [B, T-1] float32.
    """
    B, T, V = logits.shape
    assert T == max_len
    tm1 = max_len - 1

    # Glue: shift (logits drop last position, labels drop first); labels as column.
    shift_logits = logits[:, :-1, :]
    shift_labels = labels[:, 1:].astype(jnp.int32)[..., None]         # [B, tm1, 1]

    itemsize = shift_logits.dtype.itemsize
    if v_tile_max is None:
        # >=4 MiB of logits per grid step; rows stay 16 KiB contiguous.
        v_tile_max = 8192 if itemsize <= 2 else 4096
    assert t_tile_max % 8 == 0 and v_tile_max % 128 == 0

    # Generation-aware VMEM budget (v7x: 64 MiB physical -> ~52 MiB usable).
    vmem_cap = max(min(_physical_vmem_bytes() - (12 << 20), 100 << 20), 32 << 20)

    # Tile selection: full dims when small, (8,128)-aligned tiles otherwise.
    t_tile = tm1 if tm1 <= t_tile_max else t_tile_max
    v_tile = V if V <= v_tile_max else v_tile_max

    def _footprint(vt):
        # double-buffered logits tile + f32 working-set headroom + slack
        return 2 * t_tile * vt * itemsize + 3 * t_tile * vt * 4 + (2 << 20)

    while _footprint(v_tile) > vmem_cap and v_tile % 256 == 0 and v_tile > 512:
        v_tile //= 2

    n_t = pl.cdiv(tm1, t_tile)
    n_v = pl.cdiv(V, v_tile)

    if use_bf16_exp is None:
        use_bf16_exp = (shift_logits.dtype == jnp.bfloat16) and _has_bf16_eup()
    if vmem_limit_bytes is None:
        vmem_limit_bytes = vmem_cap

    cost = pl.CostEstimate(
        flops=int(5 * B * tm1 * V),
        transcendentals=int(B * tm1 * V),
        bytes_accessed=int(B * tm1 * V * itemsize + 2 * B * tm1 * 4),
    )

    kernel = functools.partial(
        _cum_ce_kernel, ignore_index=ignore_index, vocab_size=V,
        seq_len=tm1, t_tile=t_tile, v_tile=v_tile, bf16_exp=bool(use_bf16_exp))

    loss = pl.pallas_call(
        kernel,
        out_shape=jax.ShapeDtypeStruct((B, tm1, 1), jnp.float32),
        grid_spec=pltpu.PrefetchScalarGridSpec(
            num_scalar_prefetch=0,
            grid=(B, n_t, n_v),
            in_specs=[
                # TODO(synk): sweep pipeline_mode=pl.Buffered(3) on this spec if a
                # profile shows exposed DMA after the bf16-exp / tiling changes.
                pl.BlockSpec((1, t_tile, v_tile), lambda b, t, v: (b, t, v)),
                pl.BlockSpec((1, t_tile, 1), lambda b, t, v: (b, t, 0)),
            ],
            out_specs=pl.BlockSpec((1, t_tile, 1), lambda b, t, v: (b, t, 0)),
            scratch_shapes=[
                pltpu.VMEM((t_tile, 1), jnp.float32),   # running max
                pltpu.VMEM((t_tile, 1), jnp.float32),   # running exp-sum
                pltpu.VMEM((t_tile, 1), jnp.float32),   # running target logit
            ],
        ),
        compiler_params=pltpu.CompilerParams(
            # No serial carry anymore: batch AND sequence are megacore-parallel;
            # only the vocab reduction axis is serial.
            dimension_semantics=("parallel", "parallel", "arbitrary"),
            vmem_limit_bytes=int(vmem_limit_bytes),
        ),
        cost_estimate=cost,
    )(shift_logits, shift_labels)

    # Prefix sum + /pos normalization on the tiny [B, T-1] loss vector: a
    # trivial XLA op (output traffic is 1/V of the logits traffic).
    loss = loss.reshape(B, tm1)
    cum = jnp.cumsum(loss, axis=-1)
    denom = jnp.arange(1, max_len, dtype=jnp.float32)[None, :]
    return cum / denom


# ------------------------------- reference ----------------------------------

def _reference(logits, labels, *, max_len, ignore_index=-100):
    # Pure-JAX reference mirroring the PyTorch semantics.
    shift_logits = logits[:, :-1, :].astype(jnp.float32)
    shift_labels = labels[:, 1:]
    lse = jax.scipy.special.logsumexp(shift_logits, axis=-1)
    tgt = jnp.take_along_axis(
        shift_logits, jnp.clip(shift_labels, 0, None)[..., None], axis=-1
    )[..., 0]
    loss = jnp.where(shift_labels == ignore_index, 0.0, lse - tgt)
    cum = jnp.cumsum(loss, axis=-1)
    denom = jnp.arange(1, max_len, dtype=jnp.float32)[None, :]
    return cum / denom


if __name__ == "__main__":
    key = jax.random.PRNGKey(0)

    # --- Test 1: small shapes, single tile (matches module's intended use) ---
    B, MAX_LEN, V = 2, 8, 32
    k_logits, k_labels, key = jax.random.split(key, 3)
    logits = jax.random.normal(k_logits, (B, MAX_LEN, V), dtype=jnp.float32)
    labels = jax.random.randint(k_labels, (B, MAX_LEN), 0, V, dtype=jnp.int32)
    labels = labels.at[0, -2:].set(-100)
    labels = labels.at[1, 3].set(-100)

    out = cum_gpt_lm_loss(logits, labels, max_len=MAX_LEN, ignore_index=-100)
    out = jax.block_until_ready(out)
    ref = _reference(logits, labels, max_len=MAX_LEN, ignore_index=-100)
    assert out.shape == (B, MAX_LEN - 1)
    assert jnp.allclose(out, ref, atol=1e-4, rtol=1e-4), (out, ref)

    # --- Test 2: force multi-tile (seq + vocab) incl. ragged edges, f32 ---
    B2, MAX_LEN2, V2 = 2, 21, 160          # tm1=20 (8+8+4), vocab 160 (128+32)
    k_logits2, k_labels2, key = jax.random.split(key, 3)
    logits2 = jax.random.normal(k_logits2, (B2, MAX_LEN2, V2), dtype=jnp.float32)
    labels2 = jax.random.randint(k_labels2, (B2, MAX_LEN2), 0, V2, dtype=jnp.int32)
    labels2 = labels2.at[0, 5].set(-100)
    labels2 = labels2.at[1, -3:].set(-100)

    out2 = cum_gpt_lm_loss(logits2, labels2, max_len=MAX_LEN2, ignore_index=-100,
                           t_tile_max=8, v_tile_max=128)
    out2 = jax.block_until_ready(out2)
    ref2 = _reference(logits2, labels2, max_len=MAX_LEN2, ignore_index=-100)
    assert out2.shape == (B2, MAX_LEN2 - 1)
    assert jnp.allclose(out2, ref2, atol=1e-4, rtol=1e-4), (out2, ref2)

    # --- Test 3: bf16 logits, multi vocab tile + ragged tail (exercises the
    # bf16-exp path on v6e/v7x; f32-exp path on v5e). Looser tolerance. ---
    B3, MAX_LEN3, V3 = 2, 17, 384          # tm1=16 (8+8), vocab 384 (256+128)
    k_logits3, k_labels3, key = jax.random.split(key, 3)
    logits3 = jax.random.normal(k_logits3, (B3, MAX_LEN3, V3), dtype=jnp.bfloat16)
    labels3 = jax.random.randint(k_labels3, (B3, MAX_LEN3), 0, V3, dtype=jnp.int32)
    labels3 = labels3.at[0, 2].set(-100)
    labels3 = labels3.at[1, -2:].set(-100)

    out3 = cum_gpt_lm_loss(logits3, labels3, max_len=MAX_LEN3, ignore_index=-100,
                           t_tile_max=8, v_tile_max=256)
    out3 = jax.block_until_ready(out3)
    ref3 = _reference(logits3, labels3, max_len=MAX_LEN3, ignore_index=-100)
    assert out3.shape == (B3, MAX_LEN3 - 1)
    assert jnp.allclose(out3, ref3, atol=5e-2, rtol=5e-2), (out3, ref3)

    print("KERNEL_OK")
</pallas_src>

<mosaic_0001>
module attributes {stable_mosaic.version = 11 : i64} {
  func.func @_cum_ce_kernel(%arg0: i32, %arg1: i32, %arg2: i32, %arg3: memref<1x7x32xf32, #tpu.memory_space<vmem>>, %arg4: memref<1x7x1xi32, #tpu.memory_space<vmem>>, %arg5: memref<1x7x1xf32, #tpu.memory_space<vmem>>, %arg6: memref<7x1xf32, #tpu.memory_space<vmem>>, %arg7: memref<7x1xf32, #tpu.memory_space<vmem>>, %arg8: memref<7x1xf32, #tpu.memory_space<vmem>>) attributes {dimension_semantics = [#tpu.dimension_semantics<parallel>, #tpu.dimension_semantics<parallel>, #tpu.dimension_semantics<arbitrary>], iteration_bounds = array<i64: 2, 1, 1>, scalar_prefetch = 0 : i64, scratch_operands = 3 : i64, tpu.core_type = #tpu.core_type<tc>, window_params = [{transform_indices = @transform_0, window_bounds = array<i64: 1, 7, 32>}, {transform_indices = @transform_1, window_bounds = array<i64: 1, 7, 1>}, {transform_indices = @transform_2, window_bounds = array<i64: 1, 7, 1>}]} {
    %c0_i32 = arith.constant 0 : i32
    %0 = arith.cmpi eq, %arg2, %c0_i32 : i32
    %1 = arith.extui %0 : i1 to i32
    %c0_i32_0 = arith.constant 0 : i32
    %2 = arith.cmpi ne, %1, %c0_i32_0 : i32
    scf.if %2 {
      %cst_23 = arith.constant 0xFF800000 : f32
      %39 = vector.broadcast %cst_23 : f32 to vector<7x1xf32>
      %c0_24 = arith.constant 0 : index
      %c0_25 = arith.constant 0 : index
      %40 = vector.load %arg6[%c0_24, %c0_25] : memref<7x1xf32, #tpu.memory_space<vmem>>, vector<7x1xf32>
      tpu.vector_store %arg6[%c0_24, %c0_25], %39 {strides = array<i32>} : memref<7x1xf32, #tpu.memory_space<vmem>>, vector<7x1xf32>,
      %cst_26 = arith.constant 0.000000e+00 : f32
      %41 = vector.broadcast %cst_26 : f32 to vector<7x1xf32>
      %c0_27 = arith.constant 0 : index
      %c0_28 = arith.constant 0 : index
      %42 = vector.load %arg7[%c0_27, %c0_28] : memref<7x1xf32, #tpu.memory_space<vmem>>, vector<7x1xf32>
      tpu.vector_store %arg7[%c0_27, %c0_28], %41 {strides = array<i32>} : memref<7x1xf32, #tpu.memory_space<vmem>>, vector<7x1xf32>,
      %cst_29 = arith.constant 0.000000e+00 : f32
      %43 = vector.broadcast %cst_29 : f32 to vector<7x1xf32>
      %c0_30 = arith.constant 0 : index
      %c0_31 = arith.constant 0 : index
      %44 = vector.load %arg8[%c0_30, %c0_31] : memref<7x1xf32, #tpu.memory_space<vmem>>, vector<7x1xf32>
      tpu.vector_store %arg8[%c0_30, %c0_31], %43 {strides = array<i32>} : memref<7x1xf32, #tpu.memory_space<vmem>>, vector<7x1xf32>,
    } else {
    }
    %c0 = arith.constant 0 : index
    %c0_1 = arith.constant 0 : index
    %c0_2 = arith.constant 0 : index
    %3 = vector.load %arg3[%c0, %c0_1, %c0_2] : memref<1x7x32xf32, #tpu.memory_space<vmem>>, vector<1x7x32xf32>
    %4 = vector.shape_cast %3 : vector<1x7x32xf32> to vector<7x32xf32>
    %c0_3 = arith.constant 0 : index
    %c0_4 = arith.constant 0 : index
    %c0_5 = arith.constant 0 : index
    %5 = vector.load %arg4[%c0_3, %c0_4, %c0_5] : memref<1x7x1xi32, #tpu.memory_space<vmem>>, vector<1x7x1xi32>
    %6 = vector.shape_cast %5 : vector<1x7x1xi32> to vector<7x1xi32>
    %7 = tpu.iota {dimensions = array<i32: 1>} : vector<7x32xi32>
    %c32_i32 = arith.constant 32 : i32
    %8 = arith.muli %arg2, %c32_i32 : i32
    %9 = vector.broadcast %8 : i32 to vector<7x1xi32>
    %10 = arith.subi %6, %9 : vector<7x1xi32>
    %cst = arith.constant dense<0xFF800000> : vector<7xf32>
    %11 = vector.multi_reduction <maximumf>, %4, %cst [1] : vector<7x32xf32> to vector<7xf32>
    %12 = vector.shape_cast %11 : vector<7xf32> to vector<7x1xf32>
    %c0_6 = arith.constant 0 : index
    %c0_7 = arith.constant 0 : index
    %13 = vector.load %arg6[%c0_6, %c0_7] : memref<7x1xf32, #tpu.memory_space<vmem>>, vector<7x1xf32>
    %14 = arith.maximumf %13, %12 : vector<7x1xf32>
    %15 = arith.subf %13, %14 : vector<7x1xf32>
    %16 = math.exp %15 : vector<7x1xf32>
    %17 = vector.broadcast %14 : vector<7x1xf32> to vector<7x32xf32>
    %18 = arith.subf %4, %17 : vector<7x32xf32>
    %19 = math.exp %18 : vector<7x32xf32>
    %c0_8 = arith.constant 0 : index
    %c0_9 = arith.constant 0 : index
    %20 = vector.load %arg7[%c0_8, %c0_9] : memref<7x1xf32, #tpu.memory_space<vmem>>, vector<7x1xf32>
    %21 = arith.mulf %16, %20 : vector<7x1xf32>
    %cst_10 = arith.constant dense<0.000000e+00> : vector<7xf32>
    %22 = vector.multi_reduction <add>, %19, %cst_10 [1] : vector<7x32xf32> to vector<7xf32>
    %23 = vector.shape_cast %22 : vector<7xf32> to vector<7x1xf32>
    %24 = arith.addf %21, %23 : vector<7x1xf32>
    %c0_11 = arith.constant 0 : index
    %c0_12 = arith.constant 0 : index
    %25 = vector.load %arg7[%c0_11, %c0_12] : memref<7x1xf32, #tpu.memory_space<vmem>>, vector<7x1xf32>
    tpu.vector_store %arg7[%c0_11, %c0_12], %24 {strides = array<i32>} : memref<7x1xf32, #tpu.memory_space<vmem>>, vector<7x1xf32>,
    %c0_13 = arith.constant 0 : index
    %c0_14 = arith.constant 0 : index
    %26 = vector.load %arg6[%c0_13, %c0_14] : memref<7x1xf32, #tpu.memory_space<vmem>>, vector<7x1xf32>
    tpu.vector_store %arg6[%c0_13, %c0_14], %14 {strides = array<i32>} : memref<7x1xf32, #tpu.memory_space<vmem>>, vector<7x1xf32>,
    %27 = vector.broadcast %10 : vector<7x1xi32> to vector<7x32xi32>
    %28 = arith.cmpi eq, %7, %27 : vector<7x32xi32>
    %c0_15 = arith.constant 0 : index
    %c0_16 = arith.constant 0 : index
    %29 = vector.load %arg8[%c0_15, %c0_16] : memref<7x1xf32, #tpu.memory_space<vmem>>, vector<7x1xf32>
    %cst_17 = arith.constant 0.000000e+00 : f32
    %30 = vector.broadcast %cst_17 : f32 to vector<7x32xf32>
    %31 = arith.select %28, %4, %30 : vector<7x32xi1>, vector<7x32xf32>
    %cst_18 = arith.constant dense<0.000000e+00> : vector<7xf32>
    %32 = vector.multi_reduction <add>, %31, %cst_18 [1] : vector<7x32xf32> to vector<7xf32>
    %33 = vector.shape_cast %32 : vector<7xf32> to vector<7x1xf32>
    %34 = arith.addf %29, %33 : vector<7x1xf32>
    %c0_19 = arith.constant 0 : index
    %c0_20 = arith.constant 0 : index
    %35 = vector.load %arg8[%c0_19, %c0_20] : memref<7x1xf32, #tpu.memory_space<vmem>>, vector<7x1xf32>
    tpu.vector_store %arg8[%c0_19, %c0_20], %34 {strides = array<i32>} : memref<7x1xf32, #tpu.memory_space<vmem>>, vector<7x1xf32>,
    %c0_i32_21 = arith.constant 0 : i32
    %36 = arith.cmpi eq, %arg2, %c0_i32_21 : i32
    %37 = arith.extui %36 : i1 to i32
    %c0_i32_22 = arith.constant 0 : i32
    %38 = arith.cmpi ne, %37, %c0_i32_22 : i32
    scf.if %38 {
      %c0_23 = arith.constant 0 : index
      %c0_24 = arith.constant 0 : index
      %39 = vector.load %arg6[%c0_23, %c0_24] : memref<7x1xf32, #tpu.memory_space<vmem>>, vector<7x1xf32>
      %c0_25 = arith.constant 0 : index
      %c0_26 = arith.constant 0 : index
      %40 = vector.load %arg7[%c0_25, %c0_26] : memref<7x1xf32, #tpu.memory_space<vmem>>, vector<7x1xf32>
      %41 = math.log %40 : vector<7x1xf32>
      %42 = arith.addf %39, %41 : vector<7x1xf32>
      %c0_27 = arith.constant 0 : index
      %c0_28 = arith.constant 0 : index
      %43 = vector.load %arg8[%c0_27, %c0_28] : memref<7x1xf32, #tpu.memory_space<vmem>>, vector<7x1xf32>
      %44 = arith.subf %42, %43 : vector<7x1xf32>
      %c-100_i32 = arith.constant -100 : i32
      %45 = vector.broadcast %c-100_i32 : i32 to vector<7x1xi32>
      %46 = arith.cmpi ne, %6, %45 : vector<7x1xi32>
      %cst_29 = arith.constant 0.000000e+00 : f32
      %47 = vector.broadcast %cst_29 : f32 to vector<7x1xf32>
      %48 = arith.select %46, %44, %47 : vector<7x1xi1>, vector<7x1xf32>
      %49 = vector.shape_cast %48 : vector<7x1xf32> to vector<1x7x1xf32>
      %c0_30 = arith.constant 0 : index
      %c0_31 = arith.constant 0 : index
      %c0_32 = arith.constant 0 : index
      %50 = vector.load %arg5[%c0_30, %c0_31, %c0_32] : memref<1x7x1xf32, #tpu.memory_space<vmem>>, vector<1x7x1xf32>
      tpu.vector_store %arg5[%c0_30, %c0_31, %c0_32], %49 {strides = array<i32>} : memref<1x7x1xf32, #tpu.memory_space<vmem>>, vector<1x7x1xf32>,
    } else {
    }
    return
  }
  func.func @transform_0(%arg0: i32, %arg1: i32, %arg2: i32) -> (i32, i32, i32) {
    %c0_i32 = arith.constant 0 : i32
    return %arg0, %arg1, %arg2 : i32, i32, i32
  }
  func.func @transform_1(%arg0: i32, %arg1: i32, %arg2: i32) -> (i32, i32, i32) {
    %c0_i32 = arith.constant 0 : i32
    %c0_i32_0 = arith.constant 0 : i32
    return %arg0, %arg1, %c0_i32 : i32, i32, i32
  }
  func.func @transform_2(%arg0: i32, %arg1: i32, %arg2: i32) -> (i32, i32, i32) {
    %c0_i32 = arith.constant 0 : i32
    %c0_i32_0 = arith.constant 0 : i32
    return %arg0, %arg1, %c0_i32 : i32, i32, i32
  }
}

</mosaic_0001>

<bundles_post_ra>
// kernel: tpu_custom_call.1
= control target key start
LH: loop header
LB: loop body
LE: loop exit
PB: predicated region body
PF: predicated region fallthrough
CT: control target
= control target key end

     0   :  { %7 = vsyncpa [#allocation6], 0  ;;  %s912_s0 = inlined_call_operand.hbm [shape: f32[2,7,32], index: 0, kind: input, shape index: {}]   ;;  %s913_s1 = inlined_call_operand.hbm [shape: s32[2,7,1], index: 1, kind: input, shape index: {}]   ;;  %s914_s2 = inlined_call_operand.hbm [shape: f32[2,7,1], index: 2, kind: output, shape index: {}]  }
   0x1   :  { %9 = vsyncpa [#allocation6 + $0x1], 0 }
   0x2   :  { %10 = vsyncpa [#allocation9], 0 }
   0x3   :  { %12 = vsyncpa [#allocation9 + $0x1], 0 }
   0x4   :  { %13 = vsyncpa [#allocation7], 0 }
   0x5   :  { %15 = vsyncpa [#allocation7 + $0x1], 0  ;;  %s677_s9 = smov 0   ;;  %s679_s10 = smov 0  }
   0x6   :  { %s681_s11 = smov 0   ;;  %s683_s12 = smov 0  }
   0x7   :  { %s685_s13 = smov 0   ;;  %s687_s14 = smov 0  }
   0x8 LB: > { %s414_s15 = sadd.s32 4294967295, %s654_s14   ;;  %s415_s16 = sadd.s32 4294967294, %s654_s14   ;;  %s654_s14 = sphi %s687_s14, %s21_s14   ;;  %s650_s13 = sphi %s685_s13, %s934_s13   ;;  %s646_s12 = sphi %s683_s12, %s933_s12   ;;  %s642_s11 = sphi %s681_s11, %s932_s11   ;;  %s638_s10 = sphi %s679_s10, %s931_s10   ;;  %s634_s9 = sphi %s677_s9, %s930_s9  }
   0x9   : > { %s40_s17 = sadd.s32 1, %s650_s13  ;;  %s51_s18 = sadd.s32 1, %s642_s11 }
   0xa   : > { %p42_p0 = scmp.ge.s32.totalorder %s40_s17, 2  ;;  %p58_p1 = scmp.ne.s32.totalorder %s642_s11, %s638_s10 }
   0xb   : > { %p59_p2 = scmp.eq.s32.totalorder %s654_s14, 0  ;;  %p64_p3 = scmp.ne.s32.totalorder %s638_s10, %s634_s9 }
   0xc   : > { %s936_s17 = smov (%p42_p0, %s40_s17), 0  ;;  %p65_p5 = scmp.eq.s32.totalorder %s414_s15, 0 }
   0xd   : > { %p718_p4 = por %p59_p2, %p58_p1  ;;  %s44_s20 = ssub.s32 %s650_s13, %s936_s17 }
   0xe   : > { %p118_p6 = scmp.eq.s32.totalorder %s414_s15, 1  ;;  %p49_p7 = scmp.eq.s32.totalorder %s44_s20, 0 }
   0xf   : > { %p724_p8 = por %p65_p5, %p64_p3  ;;  %p124_p10 = scmp.eq.s32.totalorder %s415_s16, 1 }
  0x10   : > { %p728_p9 = por %p118_p6, %p58_p1  ;;  %p447_p13 = scmp.lt.s32.totalorder %s654_s14, 2 }
  0x11   : > { %s918_s21 = scalar_select %p724_p8, 1, 0 }
  0x12   : > { %s919_s22 = scalar_select %p728_p9, 1, 0 }
  0x13   : > { %s733_s23 = scalar_select %p49_p7, %s642_s11, %s51_s18  }
  0x14   : > { %p735_p11 = por %p124_p10, %p64_p3  ;;  %s742_s25 = sand.u32 1, %s642_s11  }
  0x15   : > { %s418_s26 = sshll.u32 %s742_s25, 3  ;;  %s419_s27 = sshll.u32 %s650_s13, 7 }
  0x16   : > { %s920_s24 = scalar_select %p735_p11, 1, 0 }
  0x17   : > { %s751_s30 = scalar_lea.hbm %s912_s0, %s419_s27  ;;  %s148_s3 = scalar_lea.vmem [#allocation5], %s418_s26 }
  0x18   : > { %s157_s4 = sshll.u32 %s148_s3, 4  ;;  %p759_p0 = pnand %p447_p13, %p718_p4  ;;  %s755_s4 = int_to_ptr.vmem [resolvable:$true] %s157_s4 }
  0x19   : > { %s145_s6 = scalar_lea.sflag [#allocation6], %s742_s25  ;;  %s508_s7 = scalar_lea.hbm %s751_s30, 128 }
  0x1a   : > { %p509_p3 = scmp.ne.s32.totalorder %s751_s30, %s508_s7  ;;  %p510_p5 = pneg %p759_p0 }
  0x1b   : > { %s513_s16 = scalar_lea.hbm %s912_s0, 256  ;;  %p514_p4 = scmp.lt.u32.totalorder %s751_s30, %s912_s0 }
  0x1c   : > { %p511_p6 = pnand %p510_p5, %p509_p3  ;;  %p515_p10 = scmp.lt.u32.totalorder %s513_s16, %s508_s7 }
  0x1d   : > { %p517_p12 = scmp.lt.u32.totalorder %s508_s7, %s751_s30 }
  0x1e   : > { %p512_p7 = pneg %p511_p6  ;;  %p516_p13 = por %p515_p10, %p514_p4 }
  0x20   : > { %p518_p1 = por %p517_p12, %p516_p13 }
  0x22   : > { %p519_p2 = pnand %p518_p1, %p512_p7 }
  0x24   : > { %522 = shalt.err (!%p519_p2)
}
  0x25   : > { %s523_s20 = scalar_lea.vmem %s755_s4, 128  ;;  %s656_s28 = smov [#allocation5]  }
  0x26   : > { %p524_p3 = scmp.ne.s32.totalorder %s755_s4, %s523_s20  ;;  %s528_s29 = sshll.u32 %s656_s28, 4  ;;  %s529_s29 = int_to_ptr.vmem [resolvable:$false] %s528_s29 }
  0x27   : > { %s530_s3 = scalar_lea.vmem %s529_s29, 256  ;;  %p531_p9 = scmp.lt.s32.totalorder %s755_s4, %s529_s29 }
  0x28   : > { %p526_p6 = pnand %p524_p3, %p510_p5  ;;  %p532_p4 = scmp.lt.s32.totalorder %s530_s3, %s523_s20 }
  0x2a   : > { %p527_p11 = pneg %p526_p6  ;;  %p533_p10 = por %p532_p4, %p531_p9 }
  0x2c   : > { %p534_p12 = pnand %p533_p10, %p527_p11 }
  0x2e   : > { %537 = shalt.err (!%p534_p12)
}
  0x2f   : > { %439 = dma.hbm_to_vmem [thread:$0]  (!%p759_p0), %s751_s30, 128, %s755_s4, %s145_s6  }
  0x30   : > { %p922_p1 = scmp.lt.s32.totalorder %s654_s14, 3  ;;  %p923_p2 = scmp.ge.s32.totalorder %s654_s14, 1 }
  0x31   : > { %s804_s16 = scalar_lea.hbm %s913_s1, %s419_s27  ;;  %s168_s18 = scalar_lea.vmem [#allocation8], %s418_s26 }
  0x32   : > { %p795_p7 = pnand %p923_p2, %p922_p1  ;;  %s176_s19 = sshll.u32 %s168_s18, 4  ;;  %s177_s19 = int_to_ptr.vmem [resolvable:$true] %s176_s19 }
  0x33   : > { %s165_s30 = scalar_lea.sflag [#allocation9], %s742_s25  ;;  %s538_s4 = scalar_lea.hbm %s804_s16, 128 }
  0x34   : > { %s924_s7 = scalar_select %p795_p7, 1, 0 }
  0x35   : > { %p539_p9 = scmp.ne.s32.totalorder %s804_s16, %s538_s4  ;;  %s543_s27 = scalar_lea.hbm %s913_s1, 256 }
  0x36   : > { %p544_p3 = scmp.lt.u32.totalorder %s804_s16, %s913_s1  ;;  %p545_p6 = scmp.lt.u32.totalorder %s543_s27, %s538_s4 }
  0x37   : > { %p541_p11 = pnand %p539_p9, %p510_p5  ;;  %p547_p10 = scmp.lt.u32.totalorder %s538_s4, %s804_s16 }
  0x38   : > { %p546_p4 = por %p545_p6, %p544_p3 }
  0x39   : > { %p542_p13 = pneg %p541_p11 }
  0x3a   : > { %p548_p12 = por %p547_p10, %p546_p4 }
  0x3c   : > { %p549_p1 = pnand %p548_p12, %p542_p13 }
  0x3e   : > { %552 = shalt.err (!%p549_p1)
}
  0x3f   : > { %s553_s25 = scalar_lea.vmem %s177_s19, 128  ;;  %s657_s26 = smov [#allocation8]  }
  0x40   : > { %p554_p2 = scmp.ne.s32.totalorder %s177_s19, %s553_s25  ;;  %s558_s3 = sshll.u32 %s657_s26, 4  ;;  %s559_s3 = int_to_ptr.vmem [resolvable:$false] %s558_s3 }
  0x41   : > { %s560_s8 = scalar_lea.vmem %s559_s3, 256  ;;  %p561_p8 = scmp.lt.s32.totalorder %s177_s19, %s559_s3 }
  0x42   : > { %p556_p9 = pnand %p554_p2, %p510_p5  ;;  %p562_p7 = scmp.lt.s32.totalorder %s560_s8, %s553_s25 }
  0x44   : > { %p557_p11 = pneg %p556_p9  ;;  %p563_p3 = por %p562_p7, %p561_p8 }
  0x46   : > { %p564_p6 = pnand %p563_p3, %p557_p11 }
  0x48   : > { %567 = shalt.err (!%p564_p6)
}
  0x49   : > { %442 = dma.hbm_to_vmem [thread:$0]  (!%p759_p0), %s804_s16, 128, %s177_s19, %s165_s30  }
  0x4a   : > { %p925_p13 = scmp.ne.s32.totalorder %s924_s7, 0 }
  0x4b   : > { %s831_s15 = sand.u32 (!%p925_p13), 1, %s638_s10   ;;  %p926_p8 = scmp.ne.s32.totalorder (!%p925_p13), %s918_s21, 0 }
  0x4c   : > { %185 = sbr.rel (%p925_p13) target bundleno = 560 (0x230), region = 28  ;;  %s834_s18 = sshll.u32 (!%p925_p13), %s831_s15, 3 }
  0x4d   : > { %s188_s4 = scalar_lea.sflag (!%p925_p13), [#allocation6], %s831_s15  ;;  %s191_s6 = scalar_lea.vmem (!%p925_p13), [#allocation5], %s834_s18 }
  0x53   : > { %621 = dma.done.wait (%p926_p8), %s188_s4, 128  }
  0x54   : > { %623 = vsyncadd (%p926_p8), %s188_s4, 4294967168  ;;  %s197_s5 = scalar_lea.sflag [#allocation9], %s831_s15  ;;  %s200_s7 = scalar_lea.vmem [#allocation8], %s834_s18 }
  0x55   : > { %625 = dma.done.wait (%p926_p8), %s197_s5, 128  }
  0x56   : > { %627 = vsyncadd (%p926_p8), %s197_s5, 4294967168  ;;  %vm230_vm0 = vcmask 6144   ;;  %v658_v0 = vmov -inf   ;;  %vm241_vm1 = vcmask 260096   ;;  %v234_v1 = vld [vmem:[%s191_s6] sm:$0x7f]  ;;  %v236_v13 = vlaneseq }
  0x57   : > { %231 = vst.msk [vmem:[#allocation2] sm:$0x7f] %vm230_vm0, %v658_v0  ;;  %v242_v2 = vsel %vm241_vm1, %v234_v1, -inf  ;;  %v659_v3 = vmov 0   ;;  %v235_v4 = vld [vmem:[%s200_s7] sm:$0x7f] }
  0x58   : > { %243 = vmax.xlane.f32.xlu0 %v242_v2  ;;  %501 = vset.pattern.permute.xlu1 %v659_v3  ;;  %v660_v5 = vmov 0.0   ;;  %v237_v14 = vand.u32 127, %v236_v13  ;;  %s427_s21 = sshll.u32 %s646_s12, 7  ;;  %s225_s16 = scalar_lea.vmem [#allocation10], %s834_s18  ;;  %vm288_vm3 = vcmp.ne.s32.totalorder %v235_v4, 4294967196 }
  0x59   : > { %500 = vset.pattern.permute.xlu0 %v659_v3  ;;  %268 = vperm.xlu1 %501, %v235_v4   ;;  %232 = vst.msk [vmem:[#allocation3] sm:$0x7f] %vm230_vm0, %v660_v5  ;;  %233 = vst.msk [vmem:[#allocation4] sm:$0x7f] %vm230_vm0, %v660_v5  ;;  %s306_s19 = sshll.u32 %s225_s16, 4  ;;  %s862_s27 = scalar_lea.hbm %s914_s2, %s427_s21  ;;  %s864_s19 = int_to_ptr.vmem [resolvable:$true] %s306_s19 }
  0x5a   : > { %s292_s28 = scalar_lea.sflag [#allocation7], %s831_s15  ;;  %s568_s29 = scalar_lea.vmem %s864_s19, 128 }
  0x5b   : > { %p569_p0 = scmp.ne.s32.totalorder %s864_s19, %s568_s29  ;;  %p927_p5 = scmp.ne.s32.totalorder %s919_s22, 0 }
  0x5c   : > { %s661_s12 = smov [#allocation10]  }
  0x5d   : > { %p570_p7 = pnand %p569_p0, %p927_p5  ;;  %s572_s25 = sshll.u32 %s661_s12, 4  ;;  %s573_s25 = int_to_ptr.vmem [resolvable:$false] %s572_s25 }
  0x5e   : > { %v245_v6 = vld [vmem:[#allocation2] sm:$0x7f]  ;;  %s574_s26 = scalar_lea.vmem %s573_s25, 256  ;;  %p575_p10 = scmp.lt.s32.totalorder %s864_s19, %s573_s25 }
  0x5f   : > { %p571_p4 = pneg %p570_p7  ;;  %p576_p12 = scmp.lt.s32.totalorder %s574_s26, %s568_s29 }
  0x60   : > { %v258_v22 = vld [vmem:[#allocation3] sm:$0x7f]  ;;  %v271_v26 = vld [vmem:[#allocation4] sm:$0x7f] }
  0x61   : > { %p577_p1 = por %p576_p12, %p575_p10 }
  0x63   : > { %p578_p2 = pnand %p577_p1, %p571_p4 }
  0xd8   : > { %v269_v15 = vpop.permute.xlu1 %268 }
  0xd9   : > { %vm270_vm2 = vcmp.eq.s32.totalorder %v237_v14, %v269_v15 }
  0xda   : > { %v272_v17 = vsel %vm270_vm2, %v234_v1, 0.0 }
  0xdb   : > { %v273_v19 = vsel %vm241_vm1, %v272_v17, 0.0 }
  0xe5   : > { %v244_v7 = vpop.xlane.xlu0 %243 }
  0xe6   : > { %v246_v8 = vmax.f32 %v245_v6, %v244_v7 }
  0xe8   : > { %v247_v9 = vsub.f32 %v245_v6, %v246_v8  ;;  %266 = vst.msk [vmem:[#allocation2] sm:$0x7f] %vm230_vm0, %v246_v8  ;;  %252 = vperm.xlu0 %500, %v246_v8  }
  0xea   : > { %v248_v20 = vmul.f32 1.442695, %v247_v9 }
  0xef   : > { %v281_v32 = vld [vmem:[#allocation2] sm:$0x7f] }
 0x167   : > { %v253_v10 = vpop.permute.xlu0 %252 }
 0x168   : > { %v255_v11 = vsub.f32 %v234_v1, %v253_v10 }
 0x16a   : > { %v256_v12 = vmul.f32 1.442695, %v255_v11 }
 0x16c   : > { %502 = vpow2.f32 %v256_v12 }
 0x16d   : > { %504 = vpow2.f32 %v248_v20 }
 0x176   : > { %v503_v16 = vpop.eup %502 }
 0x177   : > { %v260_v18 = vsel %vm241_vm1, %v503_v16, 0.0  ;;  %v505_v21 = vpop.eup %504 }
 0x178   : > { %261 = vadd.xlane.f32.xlu1 %v260_v18  ;;  %v259_v23 = vmul.f32 %v505_v21, %v258_v22 }
 0x17c   : > { %274 = vadd.xlane.f32.xlu1 %v273_v19 }
 0x205   : > { %v262_v24 = vpop.xlane.xlu1 %261 }
 0x206   : > { %v263_v25 = vadd.f32 %v262_v24, %v259_v23 }
 0x208   : > { %265 = vst.msk [vmem:[#allocation3] sm:$0x7f] %vm230_vm0, %v263_v25 }
 0x209   : > { %v275_v27 = vpop.xlane.xlu1 %274 }
 0x20a   : > { %v276_v28 = vadd.f32 %v275_v27, %v271_v26 }
 0x20c   : > { %277 = vst.msk [vmem:[#allocation4] sm:$0x7f] %vm230_vm0, %v276_v28 }
 0x20f   : > { %v282_v29 = vld [vmem:[#allocation3] sm:$0x7f] }
 0x210   : > { %506 = vlog2.f32 %v282_v29 }
 0x213   : > { %v286_v33 = vld [vmem:[#allocation4] sm:$0x7f] }
 0x21a   : > { %v507_v30 = vpop.eup %506 }
 0x21b   : > { %v284_v31 = vmul.f32 0.6931472, %v507_v30 }
 0x21d   : > { %v285_v34 = vadd.f32 %v284_v31, %v281_v32 }
 0x21f   : > { %v287_v35 = vsub.f32 %v285_v34, %v286_v33 }
 0x221   : > { %v289_v36 = vsel %vm288_vm3, %v287_v35, 0.0 }
 0x222   : > { %290 = vst.msk [vmem:[%s225_s16] sm:$0x7f] %vm230_vm0, %v289_v36 }
 0x223   : > { %581 = shalt.err (!%p578_p2)
}
 0x224   : > { %s582_s3 = scalar_lea.hbm %s862_s27, 128  ;;  %s586_s18 = scalar_lea.hbm %s914_s2, 256 }
 0x225   : > { %p583_p9 = scmp.ne.s32.totalorder %s862_s27, %s582_s3  ;;  %p587_p6 = scmp.lt.u32.totalorder %s862_s27, %s914_s2 }
 0x226   : > { %p588_p13 = scmp.lt.u32.totalorder %s586_s18, %s582_s3  ;;  %p590_p0 = scmp.lt.u32.totalorder %s582_s3, %s862_s27 }
 0x227   : > { %p584_p11 = pnand %p583_p9, %p927_p5 }
 0x228   : > { %p589_p8 = por %p588_p13, %p587_p6 }
 0x229   : > { %p585_p3 = pneg %p584_p11 }
 0x22a   : > { %p591_p7 = por %p590_p0, %p589_p8 }
 0x22c   : > { %p592_p4 = pnand %p591_p7, %p585_p3 }
 0x22e   : > { %595 = shalt.err (!%p592_p4)
}
 0x22f   : > { %434 = dma.vmem_to_hbm [thread:$0]  (%p927_p5), %s864_s19, 128, %s862_s27, %s292_s28  }
 0x230 PF: > { %s318_s5 = sand.u32 1, %s634_s9   ;;  %p928_p10 = scmp.ne.s32.totalorder %s920_s24, 0 }
 0x231   : > { %p929_p12 = scmp.ge.s32.totalorder %s654_s14, 2  ;;  %s319_s7 = scalar_lea.sflag [#allocation7], %s318_s5 }
 0x233   : > { %p444_p1 = pnand %p929_p12, %p928_p10 }
 0x235   : > { %629 = dma.done.wait (!%p444_p1), %s319_s7, 128  }
 0x236   : > { %631 = vsyncadd (!%p444_p1), %s319_s7, 4294967168  ;;  %s21_s14 = sadd.s32 1, %s654_s14   ;;  %s930_s9 = smov %s638_s10 }
 0x237   : > { %p18_p2 = scmp.ge.s32.totalorder %s21_s14, 4   ;;  %s931_s10 = smov %s642_s11 }
 0x238   : > { %s932_s11 = smov %s733_s23  ;;  %s933_s12 = smov %s650_s13 }
 0x239   : > { %s934_s13 = smov %s936_s17  ;;  %20 = sbr.rel (!%p18_p2) target bundleno = 8 (0x8), region = 94 }
 0x240   :  { %324 = vsyncpa [#allocation6], 1 }
 0x241   :  { %326 = vsyncpa [#allocation6 + $0x1], 1 }
 0x242   :  { %327 = vsyncpa [#allocation9], 1 }
 0x243   :  { %329 = vsyncpa [#allocation9 + $0x1], 1 }
 0x244   :  { %330 = vsyncpa [#allocation7], 1 }
 0x245   :  { %332 = vsyncpa [#allocation7 + $0x1], 1 }

</bundles_post_ra>
